<compile_context>
chip_gen: v7x
topology: tpu7x:2x2x1
jax: 0.10.0
libtpu: 0.0.40
codegen_flags: <defaults>
</compile_context>

<pallas_src>
import functools

import jax
import jax.numpy as jnp
from jax.experimental import pallas as pl
from jax.experimental.pallas import tpu as pltpu


_VMEM_LIMIT = 48 << 20            # safe on v5e/v6e (128 MiB) and v7x (64 MiB physical)
_FUSED_BYTES_MAX = 8 << 20        # single fused kernel below this total footprint
_XW_RESIDENT_BYTES_MAX = 12 << 20 # keep XW fully VMEM-resident in Stage 2 below this


def _round_up(x, m):
    return ((x + m - 1) // m) * m


def _pick_tile(size, unit, max_tile, min_steps=1):
    """Largest multiple of `unit` that divides `size`, is <= max_tile and (when
    possible) leaves at least `min_steps` grid steps (v7x megacore)."""
    cands = [t for t in range(unit, min(max_tile, size) + 1, unit) if size % t == 0]
    good = [t for t in cands if size // t >= min_steps]
    pool = good if good else cands
    return max(pool) if pool else size


# --------------------- glue: padded normalized adjacency (single pass) -------------
def build_normalized_adjacency_padded(edge_index, num_nodes, n_rows, n_cols,
                                      dtype=jnp.bfloat16):
    """A_hat[dst, src] = deg(dst)^-1/2 * deg(src)^-1/2 built directly at the padded
    (n_rows, n_cols) shape.  Degree / norm math stays in f32; one final cast."""
    src = edge_index[0]
    dst = edge_index[1]
    ones = jnp.ones(src.shape[0], dtype=jnp.float32)
    deg = jnp.zeros((num_nodes,), jnp.float32).at[dst].add(ones)
    dinv = jnp.where(deg > 0, 1.0 / jnp.sqrt(deg), 0.0)
    norm = dinv[src] * dinv[dst]
    a = jnp.zeros((n_rows, n_cols), jnp.float32).at[dst, src].add(norm)
    return a.astype(dtype)


# --------------------- small graphs: fully fused single kernel ---------------------
def _fused_kernel(a_ref, x_ref, wt_ref, b_ref, o_ref):
    xw = jnp.dot(x_ref[...], wt_ref[...],
                 preferred_element_type=jnp.float32).astype(jnp.bfloat16)
    out = jnp.dot(a_ref[...], xw, preferred_element_type=jnp.float32) + b_ref[...]
    o_ref[...] = out.astype(o_ref.dtype)


def _fused_forward(a_hat, x_pad, wt_pad, b_pad):
    n_rows, n_cols = a_hat.shape
    f_in_pad = x_pad.shape[1]
    f_out_pad = wt_pad.shape[1]
    return pl.pallas_call(
        _fused_kernel,
        out_shape=jax.ShapeDtypeStruct((n_rows, f_out_pad), jnp.float32),
        grid_spec=pltpu.PrefetchScalarGridSpec(
            num_scalar_prefetch=0,
            grid=(1,),
            in_specs=[
                pl.BlockSpec((n_rows, n_cols), lambda i: (0, 0)),
                pl.BlockSpec((n_cols, f_in_pad), lambda i: (0, 0)),
                pl.BlockSpec((f_in_pad, f_out_pad), lambda i: (0, 0)),
                pl.BlockSpec((1, f_out_pad), lambda i: (0, 0)),
            ],
            out_specs=pl.BlockSpec((n_rows, f_out_pad), lambda i: (0, 0)),
        ),
        compiler_params=pltpu.CompilerParams(vmem_limit_bytes=_VMEM_LIMIT),
    )(a_hat, x_pad, wt_pad, b_pad)


# --------------------- Stage 1: feature transform XW = X @ W^T ---------------------
def _xw_kernel(x_ref, wt_ref, o_ref):
    o_ref[...] = jnp.dot(
        x_ref[...], wt_ref[...], preferred_element_type=jnp.float32
    ).astype(o_ref.dtype)


def _compute_xw(x_pad, wt_pad, tile_rows):
    n_pad, f_in_pad = x_pad.shape
    f_out_pad = wt_pad.shape[1]
    return pl.pallas_call(
        _xw_kernel,
        out_shape=jax.ShapeDtypeStruct((n_pad, f_out_pad), jnp.bfloat16),
        grid_spec=pltpu.PrefetchScalarGridSpec(
            num_scalar_prefetch=0,
            grid=(n_pad // tile_rows,),
            in_specs=[
                pl.BlockSpec((tile_rows, f_in_pad), lambda i: (i, 0)),
                pl.BlockSpec((f_in_pad, f_out_pad), lambda i: (0, 0)),  # resident weight
            ],
            out_specs=pl.BlockSpec((tile_rows, f_out_pad), lambda i: (i, 0)),
        ),
        compiler_params=pltpu.CompilerParams(
            dimension_semantics=("parallel",),
            vmem_limit_bytes=_VMEM_LIMIT),
    )(x_pad, wt_pad)


# --------------------- Stage 2: aggregation out = A_hat @ XW + b -------------------
def _aggregate_kernel(a_ref, xw_ref, b_ref, o_ref, acc_ref, *, tk, xw_resident):
    k = pl.program_id(1)

    @pl.when(k == 0)
    def _():
        acc_ref[...] = jnp.zeros_like(acc_ref)

    if xw_resident:
        # XW kept fully resident in VMEM (constant index_map); slice the k-th chunk.
        off = pl.multiple_of(k * tk, 128)
        xw_tile = xw_ref[pl.ds(off, tk), :]
    else:
        xw_tile = xw_ref[...]

    acc_ref[...] += jnp.dot(a_ref[...], xw_tile, preferred_element_type=jnp.float32)

    @pl.when(k == pl.num_programs(1) - 1)
    def _():
        o_ref[...] = (acc_ref[...] + b_ref[...]).astype(o_ref.dtype)


# --------------------------------- forward wrapper ---------------------------------
def gcn_forward(x, edge_index, weight, bias, *,
                tm_max=512, tk_max=2048, s1_rows_max=2048, force_two_stage=False):
    """x: [N, F_in] f32, edge_index: [2, E] int32 (row0=src, row1=dst),
    weight: [F_out, F_in] f32, bias: [F_out] f32.  Returns [N, F_out] f32."""
    n, f_in = x.shape
    f_out = weight.shape[0]

    f_in_pad = _round_up(f_in, 128)
    f_out_pad = _round_up(f_out, 128) if f_out <= 128 else _round_up(f_out, 256)
    n_rows = _round_up(n, 8)      # output / A_hat row axis (sublane)
    n_cols = _round_up(n, 128)    # reduction axis (lanes of A_hat, rows of XW)

    # bf16 operands for the MXU-native path; accumulation stays f32 in the kernels.
    x_pad = (jnp.zeros((n_cols, f_in_pad), jnp.float32)
             .at[:n, :f_in].set(x).astype(jnp.bfloat16))
    wt_pad = (jnp.zeros((f_in_pad, f_out_pad), jnp.float32)
              .at[:f_in, :f_out].set(weight.T).astype(jnp.bfloat16))
    b_pad = jnp.zeros((1, f_out_pad), jnp.float32).at[0, :f_out].set(bias)
    a_hat = build_normalized_adjacency_padded(edge_index, n, n_rows, n_cols)

    fused_bytes = (n_rows * n_cols * 2 + n_cols * f_in_pad * 2
                   + f_in_pad * f_out_pad * 2 + f_out_pad * 4
                   + n_rows * f_out_pad * 4 + n_cols * f_out_pad * 4)
    if fused_bytes <= _FUSED_BYTES_MAX and not force_two_stage:
        out_pad = _fused_forward(a_hat, x_pad, wt_pad, b_pad)
        return out_pad[:n, :f_out]

    # ---- Stage 1: XW = X @ W^T (bf16 in, f32 accumulate, bf16 out) ----
    s1_rows = _pick_tile(n_cols, 8, s1_rows_max, min_steps=2)
    xw = _compute_xw(x_pad, wt_pad, s1_rows)

    # ---- Stage 2: out = A_hat @ XW + b (reduction axis last, f32 accumulator) ----
    tm = _pick_tile(n_rows, 8, tm_max, min_steps=2)   # >= 2 parallel steps (v7x)
    tk = _pick_tile(n_cols, 128, tk_max)
    xw_resident = n_cols * f_out_pad * 2 <= _XW_RESIDENT_BYTES_MAX
    if xw_resident:
        xw_spec = pl.BlockSpec((n_cols, f_out_pad), lambda i, k: (0, 0))
    else:
        xw_spec = pl.BlockSpec((tk, f_out_pad), lambda i, k: (k, 0))

    kernel = functools.partial(_aggregate_kernel, tk=tk, xw_resident=xw_resident)
    out_pad = pl.pallas_call(
        kernel,
        out_shape=jax.ShapeDtypeStruct((n_rows, f_out_pad), jnp.float32),
        grid_spec=pltpu.PrefetchScalarGridSpec(
            num_scalar_prefetch=0,
            grid=(n_rows // tm, n_cols // tk),
            in_specs=[
                pl.BlockSpec((tm, tk), lambda i, k: (i, k)),         # A_hat tile (bf16)
                xw_spec,                                             # XW resident/tiled
                pl.BlockSpec((1, f_out_pad), lambda i, k: (0, 0)),   # bias row
            ],
            out_specs=pl.BlockSpec((tm, f_out_pad), lambda i, k: (i, 0)),
            scratch_shapes=[pltpu.VMEM((tm, f_out_pad), jnp.float32)],
        ),
        compiler_params=pltpu.CompilerParams(
            dimension_semantics=("parallel", "arbitrary"),
            vmem_limit_bytes=_VMEM_LIMIT),
    )(a_hat, xw, b_pad)

    return out_pad[:n, :f_out]


if __name__ == "__main__":
    # Small shapes consistent with the module: N nodes, input_feat_dim -> out_dim.
    num_nodes = 16
    input_feat_dim = 8
    out_dim = 32

    key = jax.random.PRNGKey(0)
    k_x, k_w, k_e = jax.random.split(key, 3)

    # Node features.
    x = jax.random.normal(k_x, (num_nodes, input_feat_dim), dtype=jnp.float32)

    # Deterministic edge list: bidirectional ring + two chords (PyG convention:
    # row 0 = source, row 1 = target).
    src = list(range(num_nodes)) + [(i + 1) % num_nodes for i in range(num_nodes)] + [0, 5]
    dst = [(i + 1) % num_nodes for i in range(num_nodes)] + list(range(num_nodes)) + [8, 12]
    edge_index = jnp.array([src, dst], dtype=jnp.int32)  # [2, E]

    # Parameters (PyG GCNConv: Linear weight [out_dim, in_dim] glorot, bias zeros).
    limit = (6.0 / (input_feat_dim + out_dim)) ** 0.5
    weight = jax.random.uniform(
        k_w, (out_dim, input_feat_dim), minval=-limit, maxval=limit, dtype=jnp.float32)
    bias = jnp.zeros((out_dim,), dtype=jnp.float32)

    # Pure-JAX f32 reference of the same GCN math.
    def ref_gcn(xx, ei, w, b, n):
        s, d = ei[0], ei[1]
        ones = jnp.ones(s.shape[0], jnp.float32)
        deg = jnp.zeros((n,), jnp.float32).at[d].add(ones)
        dinv = jnp.where(deg > 0, 1.0 / jnp.sqrt(deg), 0.0)
        a = jnp.zeros((n, n), jnp.float32).at[d, s].add(dinv[s] * dinv[d])
        return a @ (xx @ w.T) + b[None, :]

    # 1) Small graph -> fully fused single-kernel path.
    out = jax.block_until_ready(gcn_forward(x, edge_index, weight, bias))
    ref = ref_gcn(x, edge_index, weight, bias, num_nodes)
    assert out.shape == (num_nodes, out_dim)
    assert jnp.allclose(out, ref, atol=5e-2, rtol=5e-2), "fused path mismatch vs reference"

    # 2) Also exercise the tiled two-stage path (still small / cheap) end to end.
    n2, e2 = 256, 1024
    k_x2, k_s2, k_d2 = jax.random.split(k_e, 3)
    x2 = jax.random.normal(k_x2, (n2, input_feat_dim), dtype=jnp.float32)
    ei2 = jnp.stack([jax.random.randint(k_s2, (e2,), 0, n2),
                     jax.random.randint(k_d2, (e2,), 0, n2)]).astype(jnp.int32)
    out2 = jax.block_until_ready(
        gcn_forward(x2, ei2, weight, bias, force_two_stage=True))
    ref2 = ref_gcn(x2, ei2, weight, bias, n2)
    assert out2.shape == (n2, out_dim)
    assert jnp.allclose(out2, ref2, atol=5e-2, rtol=5e-2), "two-stage path mismatch vs reference"

    print("KERNEL_OK")
</pallas_src>

<mosaic_0001>
module attributes {stable_mosaic.version = 11 : i64} {
  func.func @_fused_kernel(%arg0: i32, %arg1: memref<16x128xbf16, #tpu.memory_space<vmem>>, %arg2: memref<128x128xbf16, #tpu.memory_space<vmem>>, %arg3: memref<128x128xbf16, #tpu.memory_space<vmem>>, %arg4: memref<1x128xf32, #tpu.memory_space<vmem>>, %arg5: memref<16x128xf32, #tpu.memory_space<vmem>>) attributes {dimension_semantics = [#tpu.dimension_semantics<arbitrary>], iteration_bounds = array<i64: 1>, scalar_prefetch = 0 : i64, scratch_operands = 0 : i64, tpu.core_type = #tpu.core_type<tc>, window_params = [{pipeline_mode = #tpu.pipeline_mode<synchronous>, transform_indices = @transform_0, window_bounds = array<i64: 16, 128>}, {pipeline_mode = #tpu.pipeline_mode<synchronous>, transform_indices = @transform_1, window_bounds = array<i64: 128, 128>}, {pipeline_mode = #tpu.pipeline_mode<synchronous>, transform_indices = @transform_2, window_bounds = array<i64: 128, 128>}, {pipeline_mode = #tpu.pipeline_mode<synchronous>, transform_indices = @transform_3, window_bounds = array<i64: 1, 128>}, {pipeline_mode = #tpu.pipeline_mode<synchronous>, transform_indices = @transform_4, window_bounds = array<i64: 16, 128>}]} {
    %c0 = arith.constant 0 : index
    %c0_0 = arith.constant 0 : index
    %0 = vector.load %arg2[%c0, %c0_0] : memref<128x128xbf16, #tpu.memory_space<vmem>>, vector<128x128xbf16>
    %c0_1 = arith.constant 0 : index
    %c0_2 = arith.constant 0 : index
    %1 = vector.load %arg3[%c0_1, %c0_2] : memref<128x128xbf16, #tpu.memory_space<vmem>>, vector<128x128xbf16>
    %cst = arith.constant dense<0.000000e+00> : vector<128x128xf32>
    %2 = tpu.matmul %0, %1, %cst {dimension_numbers = #tpu.dot_dimension_numbers<[1], [0], [0], [1], [0, 0, 1, 1], [], []>} : vector<128x128xbf16>, vector<128x128xbf16>, vector<128x128xf32> -> vector<128x128xf32>
    %3 = arith.truncf %2 : vector<128x128xf32> to vector<128x128xbf16>
    %c0_3 = arith.constant 0 : index
    %c0_4 = arith.constant 0 : index
    %4 = vector.load %arg1[%c0_3, %c0_4] : memref<16x128xbf16, #tpu.memory_space<vmem>>, vector<16x128xbf16>
    %cst_5 = arith.constant dense<0.000000e+00> : vector<16x128xf32>
    %5 = tpu.matmul %4, %3, %cst_5 {dimension_numbers = #tpu.dot_dimension_numbers<[1], [0], [0], [1], [0, 0, 1, 1], [], []>} : vector<16x128xbf16>, vector<128x128xbf16>, vector<16x128xf32> -> vector<16x128xf32>
    %c0_6 = arith.constant 0 : index
    %c0_7 = arith.constant 0 : index
    %6 = vector.load %arg4[%c0_6, %c0_7] : memref<1x128xf32, #tpu.memory_space<vmem>>, vector<1x128xf32>
    %7 = vector.broadcast %6 : vector<1x128xf32> to vector<16x128xf32>
    %8 = arith.addf %5, %7 : vector<16x128xf32>
    %c0_8 = arith.constant 0 : index
    %c0_9 = arith.constant 0 : index
    %9 = vector.load %arg5[%c0_8, %c0_9] : memref<16x128xf32, #tpu.memory_space<vmem>>, vector<16x128xf32>
    tpu.vector_store %arg5[%c0_8, %c0_9], %8 {strides = array<i32>} : memref<16x128xf32, #tpu.memory_space<vmem>>, vector<16x128xf32>,
    return
  }
  func.func @transform_0(%arg0: i32) -> (i32, i32) {
    %c0_i32 = arith.constant 0 : i32
    %c0_i32_0 = arith.constant 0 : i32
    %c0_i32_1 = arith.constant 0 : i32
    return %c0_i32, %c0_i32_0 : i32, i32
  }
  func.func @transform_1(%arg0: i32) -> (i32, i32) {
    %c0_i32 = arith.constant 0 : i32
    %c0_i32_0 = arith.constant 0 : i32
    %c0_i32_1 = arith.constant 0 : i32
    return %c0_i32, %c0_i32_0 : i32, i32
  }
  func.func @transform_2(%arg0: i32) -> (i32, i32) {
    %c0_i32 = arith.constant 0 : i32
    %c0_i32_0 = arith.constant 0 : i32
    %c0_i32_1 = arith.constant 0 : i32
    return %c0_i32, %c0_i32_0 : i32, i32
  }
  func.func @transform_3(%arg0: i32) -> (i32, i32) {
    %c0_i32 = arith.constant 0 : i32
    %c0_i32_0 = arith.constant 0 : i32
    %c0_i32_1 = arith.constant 0 : i32
    return %c0_i32, %c0_i32_0 : i32, i32
  }
  func.func @transform_4(%arg0: i32) -> (i32, i32) {
    %c0_i32 = arith.constant 0 : i32
    %c0_i32_0 = arith.constant 0 : i32
    %c0_i32_1 = arith.constant 0 : i32
    return %c0_i32, %c0_i32_0 : i32, i32
  }
}

</mosaic_0001>

<bundles_post_ra>
// kernel: tpu_custom_call.1
= control target key start
LH: loop header
LB: loop body
LE: loop exit
PB: predicated region body
PF: predicated region fallthrough
CT: control target
= control target key end

     0   :  { %9 = vsyncpa [#allocation3], 0  ;;  %s687_s0 = inlined_call_operand.hbm [shape: bf16[16,128], index: 0, kind: input, shape index: {}]   ;;  %s688_s1 = inlined_call_operand.hbm [shape: bf16[128,128], index: 1, kind: input, shape index: {}]   ;;  %s689_s2 = inlined_call_operand.hbm [shape: bf16[128,128], index: 2, kind: input, shape index: {}]   ;;  %s690_s3 = inlined_call_operand.vmem [shape: f32[1,128], index: 3, kind: input, shape index: {}]   ;;  %s691_s4 = inlined_call_operand.hbm [shape: f32[16,128], index: 4, kind: output, shape index: {}]  }
   0x1   :  { %10 = vsyncpa [#allocation6], 0 }
   0x2   :  { %11 = vsyncpa [#allocation4], 0  ;;  %s585_s15 = smov [#allocation5]   ;;  %s586_s17 = smov [#allocation2]  }
   0x3   :  { %s29_s16 = sshll.u32 %s585_s15, 4  ;;  %s17_s18 = sshll.u32 %s586_s17, 4  ;;  %s30_s16 = int_to_ptr.vmem [resolvable:$true] %s29_s16  ;;  %s620_s18 = int_to_ptr.vmem [resolvable:$true] %s17_s18 }
   0x4   :  { %s491_s21 = scalar_lea.hbm %s688_s1, 1024 }
   0x5   :  { %p492_p0 = scmp.ne.s32.totalorder %s688_s1, %s491_s21  ;;  %p495_p1 = scmp.lt.u32.totalorder %s491_s21, %s688_s1 }
   0x7   :  { %p497_p2 = pnand %p495_p1, %p492_p0 }
   0x9   :  { %500 = shalt.err (!%p497_p2)
}
   0xa   :  { %s501_s26 = scalar_lea.vmem %s30_s16, 1024  ;;  %p506_p4 = scmp.lt.s32.totalorder %s30_s16, %s30_s16 }
   0xb   :  { %p502_p3 = scmp.ne.s32.totalorder %s30_s16, %s501_s26  ;;  %p507_p5 = scmp.lt.s32.totalorder %s501_s26, %s501_s26 }
   0xd   :  { %p508_p6 = por %p507_p5, %p506_p4 }
   0xf   :  { %p509_p7 = pnand %p508_p6, %p502_p3 }
  0x11   :  { %512 = shalt.err (!%p509_p7)
}
  0x12   :  { %s587_s27 = smov 64   ;;  %s588_s28 = smov 4  }
  0x13   :  { %35 = dma.hbm_to_vmem [thread:$0]  %s688_s1, 1024, %s30_s16, [#allocation6], %s587_s27, %s587_s27, %s588_s28  }
  0x14   :  { %s513_s7 = scalar_lea.hbm %s687_s0, 128 }
  0x15   :  { %p514_p8 = scmp.ne.s32.totalorder %s687_s0, %s513_s7  ;;  %p517_p9 = scmp.lt.u32.totalorder %s513_s7, %s687_s0 }
  0x17   :  { %p519_p10 = pnand %p517_p9, %p514_p8 }
  0x19   :  { %522 = shalt.err (!%p519_p10)
}
  0x1a   :  { %s523_s12 = scalar_lea.vmem %s620_s18, 128  ;;  %p528_p12 = scmp.lt.s32.totalorder %s620_s18, %s620_s18 }
  0x1b   :  { %p524_p11 = scmp.ne.s32.totalorder %s620_s18, %s523_s12  ;;  %p529_p13 = scmp.lt.s32.totalorder %s523_s12, %s523_s12 }
  0x1d   :  { %p530_p0 = por %p529_p13, %p528_p12 }
  0x1f   :  { %p531_p1 = pnand %p530_p0, %p524_p11 }
  0x21   :  { %534 = shalt.err (!%p531_p1)
}
  0x22   :  { %23 = dma.hbm_to_vmem [thread:$0]  %s687_s0, 128, %s620_s18, [#allocation3], %s587_s27, %s587_s27, %s588_s28  }
  0x23   :  { %s589_s14 = smov [#allocation7]   ;;  %s535_s19 = scalar_lea.hbm %s689_s2, 1024 }
  0x24   :  { %s41_s15 = sshll.u32 %s589_s14, 4  ;;  %p536_p2 = scmp.ne.s32.totalorder %s689_s2, %s535_s19  ;;  %s42_s15 = int_to_ptr.vmem [resolvable:$true] %s41_s15 }
  0x25   :  { %p539_p3 = scmp.lt.u32.totalorder %s535_s19, %s689_s2 }
  0x27   :  { %p541_p4 = pnand %p539_p3, %p536_p2 }
  0x29   :  { %544 = shalt.err (!%p541_p4)
}
  0x2a   :  { %s545_s24 = scalar_lea.vmem %s42_s15, 1024  ;;  %p550_p6 = scmp.lt.s32.totalorder %s42_s15, %s42_s15 }
  0x2b   :  { %p546_p5 = scmp.ne.s32.totalorder %s42_s15, %s545_s24  ;;  %p551_p7 = scmp.lt.s32.totalorder %s545_s24, %s545_s24 }
  0x2d   :  { %p552_p8 = por %p551_p7, %p550_p6 }
  0x2f   :  { %p553_p9 = pnand %p552_p8, %p546_p5 }
  0x31   :  { %556 = shalt.err (!%p553_p9)
}
  0x32   :  { %47 = dma.hbm_to_vmem [thread:$0]  %s689_s2, 1024, %s42_s15, [#allocation6], %s587_s27, %s587_s27, %s588_s28  }
  0x33   :  { %579 = dma.done.wait [#allocation3], 128  }
  0x34   :  { %580 = vsyncadd [#allocation3], 4294967168 }
  0x35   :  { %581 = dma.done.wait [#allocation6], 2048  }
  0x36   :  { %582 = vsyncadd [#allocation6], 4294965248  ;;  %v474_v0 = vld [vmem:[#allocation7] sm:$0xff]   ;;  %v475_v1 = vld [vmem:[#allocation7 + $0x8] sm:$0xff]   ;;  %v590_v16 = vmov 0.0   ;;  %vm591_vm0 = vmmov 0  }
  0x37   :  { %412 = vmatprep.subr.bf16.mxu0 %v474_v0  ;;  %v476_v2 = vld [vmem:[#allocation7 + $0x10] sm:$0xff]   ;;  %v477_v3 = vld [vmem:[#allocation7 + $0x18] sm:$0xff]   ;;  %v482_v4 = vld [vmem:[#allocation5] sm:$0xff]   ;;  %444 = vmatprep.subr.bf16.mxu1 %v590_v16  ;;  %s592_s26 = smov [#allocation8]  }
  0x38   :  { %413 = vmatpush3.bf16.msra.mxu0 %v474_v0  ;;  %428 = vmatprep.mubr.bf16.mxu0 %v482_v4  ;;  %v478_v5 = vld [vmem:[#allocation7 + $0x20] sm:$0xff]   ;;  %v479_v6 = vld [vmem:[#allocation7 + $0x28] sm:$0xff]   ;;  %v480_v7 = vld [vmem:[#allocation7 + $0x30] sm:$0xff]   ;;  %s356_s27 = sshll.u32 %s592_s26, 4  ;;  %s357_s27 = int_to_ptr.vmem [resolvable:$true] %s356_s27 }
  0x39   :  { %414 = vmatprep.subr.bf16.mxu0 %v475_v1  ;;  %v481_v8 = vld [vmem:[#allocation7 + $0x38] sm:$0xff]   ;;  %v483_v9 = vld [vmem:[#allocation5 + $0x8] sm:$0xff]   ;;  %v484_v10 = vld [vmem:[#allocation5 + $0x10] sm:$0xff]   ;;  %460 = vmatprep.mubr.msk.bf16.mxu1 %vm591_vm0, %v590_v16  ;;  %s557_s28 = scalar_lea.vmem %s357_s27, 256  ;;  %p562_p11 = scmp.lt.s32.totalorder %s357_s27, %s357_s27 }
  0x3a   :  { %v485_v11 = vld [vmem:[#allocation5 + $0x18] sm:$0xff]   ;;  %v486_v12 = vld [vmem:[#allocation5 + $0x20] sm:$0xff]   ;;  %v487_v13 = vld [vmem:[#allocation5 + $0x28] sm:$0xff]   ;;  %p558_p10 = scmp.ne.s32.totalorder %s357_s27, %s557_s28  ;;  %p563_p12 = scmp.lt.s32.totalorder %s557_s28, %s557_s28 }
  0x3b   :  { %v488_v14 = vld [vmem:[#allocation5 + $0x30] sm:$0xff]   ;;  %v489_v15 = vld [vmem:[#allocation5 + $0x38] sm:$0xff]  }
  0x3c   :  { %415 = vmatpush3.bf16.msra.mxu0 %v475_v1  ;;  %v490_v41 = vld [vmem:[#allocation2] sm:$0xff]   ;;  %p564_p13 = por %p563_p12, %p562_p11 }
  0x3d   :  { %416 = vmatprep.subr.bf16.mxu0 %v476_v2  ;;  %v385_v42 = vld [vmem:[%s690_s3] ss:$0 sm:$0xff] }
  0x3e   :  { %p565_p0 = pnand %p564_p13, %p558_p10 }
  0x40   :  { %417 = vmatpush3.bf16.msra.mxu0 %v476_v2 }
  0x41   :  { %418 = vmatprep.subr.bf16.mxu0 %v477_v3 }
  0x44   :  { %419 = vmatpush3.bf16.msra.mxu0 %v477_v3 }
  0x45   :  { %420 = vmatprep.subr.bf16.mxu0 %v478_v5 }
  0x48   :  { %421 = vmatpush3.bf16.msra.mxu0 %v478_v5 }
  0x49   :  { %422 = vmatprep.subr.bf16.mxu0 %v479_v6 }
  0x4c   :  { %423 = vmatpush3.bf16.msra.mxu0 %v479_v6 }
  0x4d   :  { %424 = vmatprep.subr.bf16.mxu0 %v480_v7 }
  0x50   :  { %425 = vmatpush3.bf16.msra.mxu0 %v480_v7 }
  0x51   :  { %426 = vmatprep.subr.bf16.mxu0 %v481_v8 }
  0x54   :  { %427 = vmatpush3.bf16.msra.mxu0 %v481_v8 }
  0x57   :  { %429 = vmatmul.mubr.bf16.vlgmr.msra.gmra.mrb[0].mxu0 %v483_v9 }
  0x58   :  { %432 = vmatprep.mubr.bf16.mxu0 %v484_v10 }
  0x5f   :  { %433 = vmatmul.mubr.bf16.gmra.mrb[4].mxu0 %v485_v11 }
  0x60   :  { %436 = vmatprep.mubr.bf16.mxu0 %v486_v12 }
  0x67   :  { %437 = vmatmul.mubr.bf16.gmra.mrb[8].mxu0 %v487_v13 }
  0x68   :  { %440 = vmatprep.mubr.bf16.mxu0 %v488_v14 }
  0x6f   :  { %441 = vmatmul.mubr.bf16.gmra.mrb[12].mxu0 %v489_v15 }
 0x12a   :  { %v430_v17 = vpop.f32.mrb[0].mxu0 }
 0x12b   :  { %v222_v18 = vpop.f32.mrb[1].mxu0 }
 0x12c   :  { %v431_v19 = vpop.f32.mrb[2].mxu0 }
 0x12d   :  { %v286_v20 = vpack.c.bf16 %v431_v19, %v430_v17  ;;  %v225_v21 = vpop.f32.mrb[3].mxu0 }
 0x12e   :  { %v285_v22 = vpack.c.bf16 %v225_v21, %v222_v18 }
 0x130   :  { %445 = vmatpush3.bf16.msra.mxu1 %v285_v22 }
 0x131   :  { %446 = vmatprep.subr.bf16.mxu1 %v590_v16 }
 0x132   :  { %v434_v23 = vpop.f32.mrb[4].mxu0 }
 0x133   :  { %v238_v24 = vpop.f32.mrb[5].mxu0 }
 0x134   :  { %v435_v25 = vpop.f32.mrb[6].mxu0  ;;  %447 = vmatpush3.bf16.msra.mxu1 %v286_v20 }
 0x135   :  { %v288_v26 = vpack.c.bf16 %v435_v25, %v434_v23  ;;  %v241_v27 = vpop.f32.mrb[7].mxu0  ;;  %448 = vmatprep.subr.bf16.mxu1 %v590_v16 }
 0x136   :  { %v287_v28 = vpack.c.bf16 %v241_v27, %v238_v24 }
 0x138   :  { %449 = vmatpush3.bf16.msra.mxu1 %v287_v28 }
 0x139   :  { %450 = vmatprep.subr.bf16.mxu1 %v590_v16 }
 0x13a   :  { %v438_v29 = vpop.f32.mrb[8].mxu0 }
 0x13b   :  { %v254_v30 = vpop.f32.mrb[9].mxu0 }
 0x13c   :  { %v439_v31 = vpop.f32.mrb[10].mxu0  ;;  %451 = vmatpush3.bf16.msra.mxu1 %v288_v26 }
 0x13d   :  { %v290_v32 = vpack.c.bf16 %v439_v31, %v438_v29  ;;  %v257_v33 = vpop.f32.mrb[11].mxu0  ;;  %452 = vmatprep.subr.bf16.mxu1 %v590_v16 }
 0x13e   :  { %v289_v34 = vpack.c.bf16 %v257_v33, %v254_v30 }
 0x140   :  { %453 = vmatpush3.bf16.msra.mxu1 %v289_v34 }
 0x141   :  { %454 = vmatprep.subr.bf16.mxu1 %v590_v16 }
 0x142   :  { %v442_v35 = vpop.f32.mrb[12].mxu0 }
 0x143   :  { %v270_v36 = vpop.f32.mrb[13].mxu0 }
 0x144   :  { %v443_v37 = vpop.f32.mrb[14].mxu0  ;;  %455 = vmatpush3.bf16.msra.mxu1 %v290_v32 }
 0x145   :  { %v292_v38 = vpack.c.bf16 %v443_v37, %v442_v35  ;;  %v273_v39 = vpop.f32.mrb[15].mxu0  ;;  %456 = vmatprep.subr.bf16.mxu1 %v590_v16 }
 0x146   :  { %v291_v40 = vpack.c.bf16 %v273_v39, %v270_v36 }
 0x148   :  { %457 = vmatpush3.bf16.msra.mxu1 %v291_v40 }
 0x149   :  { %458 = vmatprep.subr.bf16.mxu1 %v590_v16 }
 0x14c   :  { %459 = vmatpush3.bf16.msra.mxu1 %v292_v38 }
 0x14f   :  { %461 = vmatmul.mubr.bf16.vlgmr.msra.gmra.mrb[0].mxu1 %v490_v41 }
 0x222   :  { %v342_v43 = vpop.f32.mrb[0].mxu1 }
 0x223   :  { %v343_v44 = vadd.f32 %v385_v42, %v342_v43  ;;  %v462_v45 = vpop.f32.mrb[1].mxu1 }
 0x224   :  { %v345_v46 = vpop.f32.mrb[2].mxu1 }
 0x225   :  { %349 = vst [vmem:[#allocation8] sm:$0xff] %v343_v44  ;;  %v346_v47 = vadd.f32 %v385_v42, %v345_v46  ;;  %v463_v48 = vpop.f32.mrb[3].mxu1 }
 0x227   :  { %350 = vst [vmem:[#allocation8 + $0x8] sm:$0xff] %v346_v47 }
 0x228   :  { %568 = shalt.err (!%p565_p0)
}
 0x229   :  { %s569_s30 = scalar_lea.hbm %s691_s4, 256 }
 0x22a   :  { %p570_p1 = scmp.ne.s32.totalorder %s691_s4, %s569_s30  ;;  %p573_p2 = scmp.lt.u32.totalorder %s569_s30, %s691_s4 }
 0x22c   :  { %p575_p3 = pnand %p573_p2, %p570_p1 }
 0x22e   :  { %578 = shalt.err (!%p575_p3)
}
 0x22f   :  { %s593_s9 = smov 128   ;;  %s594_s10 = smov 8  }
 0x230   :  { %362 = dma.vmem_to_hbm [thread:$0]  %s357_s27, 256, %s691_s4, [#allocation4], %s593_s9, %s593_s9, %s594_s10  }
 0x231   :  { %583 = dma.done.wait [#allocation4], 256  }
 0x232   :  { %584 = vsyncadd [#allocation4], 4294967040 }
 0x233   :  { %366 = vsyncpa [#allocation3], 1 }
 0x234   :  { %367 = vsyncpa [#allocation6], 1 }
 0x235   :  { %368 = vsyncpa [#allocation4], 1 }

</bundles_post_ra>
